<compile_context>
chip_gen: v7x
topology: tpu7x:2x2x1
jax: 0.10.0
libtpu: 0.0.40
codegen_flags: <defaults>
</compile_context>

<pallas_src>
import jax
import jax.numpy as jnp
from jax.experimental import pallas as pl
from jax.experimental.pallas import tpu as pltpu


def _copy_kernel(x_ref, o_ref):
    # Pure pass-through on the current (tile_rows, lane) VMEM tile.  Because
    # the output HBM buffer aliases the input, the writeback lands in place.
    o_ref[...] = x_ref[...]


# Lane-dense widths (all multiples of 128); widest that divides the flattened
# size wins, so stores are unmasked full-lane vst.
_LANE_CANDIDATES = (8192, 4096, 2048, 1024, 512, 256, 128)
# Target ~2 MiB per block buffer: with double-buffered input + output that is
# ~8 MiB of live VMEM — safe on v5e (16 MiB scoped default), v6e (32 MiB) and
# v7x (64 MiB physical).
_TARGET_BLOCK_BYTES = 2 * 1024 * 1024
_VMEM_LIMIT_BYTES = 32 * 1024 * 1024


def _round_up(a, b):
    return ((a + b - 1) // b) * b


def _choose_tile_rows(rows, lane, itemsize):
    max_rows_by_bytes = max(8, (_TARGET_BLOCK_BYTES // (lane * itemsize)) // 8 * 8)
    if rows <= max_rows_by_bytes:
        return rows  # full row extent is always a legal block dim
    return max_rows_by_bytes  # multiple of 8, lane already multiple of 128


def _lane_dense_copy(x2d):
    rows, lane = x2d.shape
    tile_rows = _choose_tile_rows(rows, lane, x2d.dtype.itemsize)
    grid = (pl.cdiv(rows, tile_rows),)
    return pl.pallas_call(
        _copy_kernel,
        out_shape=jax.ShapeDtypeStruct((rows, lane), x2d.dtype),
        grid=grid,
        in_specs=[pl.BlockSpec((tile_rows, lane), lambda i: (i, 0))],
        out_specs=pl.BlockSpec((tile_rows, lane), lambda i: (i, 0)),
        # Output aliases the input buffer: no second HBM allocation for the
        # result of this no-op.
        input_output_aliases={0: 0},
        compiler_params=pltpu.CompilerParams(
            dimension_semantics=("parallel",),  # v7x: shard rows over 2 TCs
            vmem_limit_bytes=_VMEM_LIMIT_BYTES,
        ),
    )(x2d)


def identity_forward(x: jax.Array) -> jax.Array:
    """Pallas TPU implementation of Identity.forward (exact no-op).

    In production the correct implementation is simply `return x`; the kernel
    below is a roofline-friendly copy kept only because a kernel boundary is
    required for this exercise.
    """
    orig_shape = x.shape
    n = x.size
    if n == 0:
        return x

    flat = x.reshape(-1)

    lane = next((l for l in _LANE_CANDIDATES if n % l == 0), None)
    if lane is not None:
        out = _lane_dense_copy(flat.reshape(n // lane, lane))
        return out.reshape(orig_shape)

    # Ragged total size (not a multiple of 128): pad up to a lane-dense slab,
    # copy, then slice the valid prefix back out.  Keeps the hot path fully
    # unmasked instead of shrinking the lane width globally.
    lane = 128
    padded_n = _round_up(n, lane)
    flat_p = jnp.pad(flat, (0, padded_n - n))
    out = _lane_dense_copy(flat_p.reshape(padded_n // lane, lane))
    return out.reshape(-1)[:n].reshape(orig_shape)


if __name__ == "__main__":
    key = jax.random.PRNGKey(0)

    # 1) Primary input implied by the module (NCHW-style activation).
    x1 = jax.random.normal(key, (2, 4, 16, 16), dtype=jnp.float32)
    y1 = identity_forward(x1)
    jax.block_until_ready(y1)
    assert y1.shape == x1.shape and y1.dtype == x1.dtype
    assert bool(jnp.array_equal(y1, x1))

    # 2) Larger slab: exercises the multi-block tiled (double-buffered) path.
    k2, k3 = jax.random.split(key)
    x2 = jax.random.normal(k2, (512, 2048), dtype=jnp.float32)
    y2 = identity_forward(x2)
    jax.block_until_ready(y2)
    assert y2.shape == x2.shape and y2.dtype == x2.dtype
    assert bool(jnp.array_equal(y2, x2))

    # 3) Ragged size (105 elements, bf16): exercises the pad-and-slice path.
    x3 = jax.random.normal(k3, (3, 5, 7), dtype=jnp.bfloat16)
    y3 = identity_forward(x3)
    jax.block_until_ready(y3)
    assert y3.shape == x3.shape and y3.dtype == x3.dtype
    assert bool(jnp.array_equal(y3, x3))

    print("KERNEL_OK")
</pallas_src>

<mosaic_0001>
module attributes {stable_mosaic.version = 11 : i64} {
  func.func @_copy_kernel(%arg0: i32, %arg1: memref<1x2048xf32, #tpu.memory_space<vmem>>, %arg2: memref<1x2048xf32, #tpu.memory_space<vmem>>) attributes {dimension_semantics = [#tpu.dimension_semantics<parallel>], iteration_bounds = array<i64: 1>, scalar_prefetch = 0 : i64, scratch_operands = 0 : i64, tpu.core_type = #tpu.core_type<tc>, window_params = [{transform_indices = @transform_0, window_bounds = array<i64: 1, 2048>}, {transform_indices = @transform_1, window_bounds = array<i64: 1, 2048>}]} {
    %c0 = arith.constant 0 : index
    %c0_0 = arith.constant 0 : index
    %0 = vector.load %arg1[%c0, %c0_0] : memref<1x2048xf32, #tpu.memory_space<vmem>>, vector<1x2048xf32>
    %c0_1 = arith.constant 0 : index
    %c0_2 = arith.constant 0 : index
    %1 = vector.load %arg2[%c0_1, %c0_2] : memref<1x2048xf32, #tpu.memory_space<vmem>>, vector<1x2048xf32>
    tpu.vector_store %arg2[%c0_1, %c0_2], %0 {strides = array<i32>} : memref<1x2048xf32, #tpu.memory_space<vmem>>, vector<1x2048xf32>,
    return
  }
  func.func @transform_0(%arg0: i32) -> (i32, i32) {
    %c0_i32 = arith.constant 0 : i32
    %c0_i32_0 = arith.constant 0 : i32
    return %arg0, %c0_i32 : i32, i32
  }
  func.func @transform_1(%arg0: i32) -> (i32, i32) {
    %c0_i32 = arith.constant 0 : i32
    %c0_i32_0 = arith.constant 0 : i32
    return %arg0, %c0_i32 : i32, i32
  }
}

</mosaic_0001>

<bundles_post_ra>
// kernel: tpu_custom_call.1
= control target key start
LH: loop header
LB: loop body
LE: loop exit
PB: predicated region body
PF: predicated region fallthrough
CT: control target
= control target key end

     0   :  { %6 = vsyncpa [#allocation3], 0  ;;  %s126_s0 = inlined_call_operand.hbm [shape: f32[1,2048], index: 0, kind: input, shape index: {}, may-alias: {0,1}]   ;;  %s127_s1 = inlined_call_operand.hbm [shape: f32[1,2048], index: 1, kind: output, shape index: {}, may-alias: {0,1}]  }
   0x1   :  { %7 = vsyncpa [#allocation4], 0  ;;  %s90_s6 = smov [#allocation2]   ;;  %s42_s10 = scalar_lea.hbm %s126_s0, 256 }
   0x2   :  { %s14_s7 = sshll.u32 %s90_s6, 4  ;;  %p43_p0 = scmp.ne.s32.totalorder %s126_s0, %s42_s10  ;;  %s15_s7 = int_to_ptr.vmem [resolvable:$true] %s14_s7 }
   0x3   :  { %p46_p1 = scmp.lt.u32.totalorder %s42_s10, %s126_s0 }
   0x5   :  { %p48_p2 = pnand %p46_p1, %p43_p0 }
   0x7   :  { %51 = shalt.err (!%p48_p2)
}
   0x8   :  { %s52_s15 = scalar_lea.vmem %s15_s7, 256  ;;  %p57_p4 = scmp.lt.s32.totalorder %s15_s7, %s15_s7 }
   0x9   :  { %p53_p3 = scmp.ne.s32.totalorder %s15_s7, %s52_s15  ;;  %p58_p5 = scmp.lt.s32.totalorder %s52_s15, %s52_s15 }
   0xb   :  { %p59_p6 = por %p58_p5, %p57_p4 }
   0xd   :  { %p60_p7 = pnand %p59_p6, %p53_p3 }
   0xf   :  { %63 = shalt.err (!%p60_p7)
}
  0x10   :  { %17 = dma.hbm_to_vmem [thread:$0]  %s126_s0, 256, %s15_s7, [#allocation3]  }
  0x11   :  { %86 = dma.done.wait [#allocation3], 256  }
  0x12   :  { %87 = vsyncadd [#allocation3], 4294967040  ;;  %s91_s18 = smov [#allocation5]   ;;  %v21_v0 = vld [vmem:[#allocation2] sm:$0xff]  ;;  %v22_v1 = vld [vmem:[#allocation2 + $0x8] sm:$0xff] }
  0x13   :  { %s31_s19 = sshll.u32 %s91_s18, 4  ;;  %23 = vst [vmem:[#allocation5] sm:$0xff] %v21_v0  ;;  %24 = vst [vmem:[#allocation5 + $0x8] sm:$0xff] %v22_v1  ;;  %s32_s19 = int_to_ptr.vmem [resolvable:$true] %s31_s19 }
  0x14   :  { %s64_s20 = scalar_lea.vmem %s32_s19, 256  ;;  %p69_p9 = scmp.lt.s32.totalorder %s32_s19, %s32_s19 }
  0x15   :  { %p65_p8 = scmp.ne.s32.totalorder %s32_s19, %s64_s20  ;;  %p70_p10 = scmp.lt.s32.totalorder %s64_s20, %s64_s20 }
  0x17   :  { %p71_p11 = por %p70_p10, %p69_p9 }
  0x19   :  { %p72_p12 = pnand %p71_p11, %p65_p8 }
  0x1b   :  { %75 = shalt.err (!%p72_p12)
}
  0x1c   :  { %s76_s0 = scalar_lea.hbm %s127_s1, 256 }
  0x1d   :  { %p77_p13 = scmp.ne.s32.totalorder %s127_s1, %s76_s0  ;;  %p80_p0 = scmp.lt.u32.totalorder %s76_s0, %s127_s1 }
  0x1f   :  { %p82_p1 = pnand %p80_p0, %p77_p13 }
  0x21   :  { %85 = shalt.err (!%p82_p1)
}
  0x22   :  { %34 = dma.vmem_to_hbm [thread:$0]  %s32_s19, 256, %s127_s1, [#allocation4]  }
  0x23   :  { %88 = dma.done.wait [#allocation4], 256  }
  0x24   :  { %89 = vsyncadd [#allocation4], 4294967040 }
  0x25   :  { %38 = vsyncpa [#allocation3], 1 }
  0x26   :  { %39 = vsyncpa [#allocation4], 1 }

</bundles_post_ra>
